<compile_context>
chip_gen: v6e
topology: v6e:2x2x1
jax: 0.10.0
libtpu: 0.0.40
codegen_flags: <defaults>
</compile_context>

<pallas_src>
import functools

import jax
import jax.numpy as jnp
from jax.experimental import pallas as pl
from jax.experimental.pallas import tpu as pltpu


def _round_up(x, m):
    return (x + m - 1) // m * m


def _pick_tile(n_pad, cap=512):
    """Largest multiple of 128 <= cap that divides n_pad (n_pad % 128 == 0)."""
    t = min(cap, n_pad)
    while n_pad % t:
        t -= 128
    return t


# ---------------------------------------------------------------------------
# Kernel 1: fused degree pass + int8 cast of adj (single read of f32 adj).
#   d = 1/sqrt(adj.sum(1) + 1);  adj_i8 = int8(adj)
#   grid = (row tiles, col tiles); col axis is the reduction for d.
# ---------------------------------------------------------------------------
def _degree_cast_kernel(adj_ref, adj_i8_ref, d_ref, acc_ref):
    k = pl.program_id(1)

    @pl.when(k == 0)
    def _():
        acc_ref[...] = jnp.zeros_like(acc_ref)

    a = adj_ref[...]
    adj_i8_ref[...] = a.astype(jnp.int8)          # 0/1 entries -> exact
    acc_ref[...] += jnp.sum(a, axis=1, keepdims=True)

    @pl.when(k == pl.num_programs(1) - 1)
    def _():
        # +1.0 is the self loop => degree >= 1, so no inf guard is needed.
        d_ref[...] = jax.lax.rsqrt(acc_ref[...] + 1.0)


# ---------------------------------------------------------------------------
# Kernel 2: prologue.   X_s = d[:, None] * (H @ W.T), emitted as bf16.
#   grid = (row tiles,); W.T is small and kept fully resident.
# ---------------------------------------------------------------------------
def _xw_kernel(h_ref, wt_ref, d_ref, xs_ref):
    x = jnp.dot(h_ref[...], wt_ref[...], preferred_element_type=jnp.float32)
    xs_ref[...] = (x * d_ref[...]).astype(xs_ref.dtype)


# ---------------------------------------------------------------------------
# Kernel 3a: main aggregation, X_s fully VMEM-resident (preferred path).
#   out = relu(d_row * (adj @ X_s + X_s))    (X_s already carries d_col)
#   grid = (row tiles, reduction tiles over adj columns)
# ---------------------------------------------------------------------------
def _make_spmm_resident_kernel(tm, tk):
    def kernel(d_ref, adj_ref, xs_ref, o_ref, acc_ref):
        i = pl.program_id(0)
        k = pl.program_id(1)

        @pl.when(k == 0)
        def _():
            # "+I" contribution: this row block's own (d-scaled) features.
            row0 = pl.multiple_of(i * tm, 128)
            acc_ref[...] = xs_ref[pl.ds(row0, tm), :].astype(jnp.float32)

        red0 = pl.multiple_of(k * tk, 128)
        acc_ref[...] += jnp.dot(adj_ref[...].astype(jnp.bfloat16),
                                xs_ref[pl.ds(red0, tk), :],
                                preferred_element_type=jnp.float32)

        @pl.when(k == pl.num_programs(1) - 1)
        def _():
            o_ref[...] = jnp.maximum(acc_ref[...] * d_ref[...], 0.0
                                     ).astype(o_ref.dtype)

    return kernel


# ---------------------------------------------------------------------------
# Kernel 3b: streamed fallback (X_s too big for VMEM residency).
# ---------------------------------------------------------------------------
def _spmm_streamed_kernel(d_ref, adj_ref, xs_row_ref, xs_red_ref, o_ref,
                          acc_ref):
    k = pl.program_id(1)

    @pl.when(k == 0)
    def _():
        acc_ref[...] = xs_row_ref[...].astype(jnp.float32)

    acc_ref[...] += jnp.dot(adj_ref[...].astype(jnp.bfloat16), xs_red_ref[...],
                            preferred_element_type=jnp.float32)

    @pl.when(k == pl.num_programs(1) - 1)
    def _():
        o_ref[...] = jnp.maximum(acc_ref[...] * d_ref[...], 0.0
                                 ).astype(o_ref.dtype)


def gcn_layer(H, adj, W, *, tile_cap=512):
    """GCN forward: relu(D^-1/2 (adj + I) D^-1/2 @ H @ W.T).

    H: [N, F_in], adj: [N, N] (0/1, symmetric), W: [F_out, F_in] (nn.Linear).
    Returns [N, F_out] float32.
    """
    N, F_in = H.shape
    F_out = W.shape[0]

    # Pad to 128 multiples (lane-dense stores, full-width MXU operands);
    # tiling granularity is chosen independently below.
    n_pad = _round_up(N, 128)
    fi_pad = _round_up(F_in, 128)
    fo_pad = _round_up(F_out, 128)
    tm = tk = _pick_tile(n_pad, tile_cap)

    h_p = jnp.pad(H.astype(jnp.float32),
                  ((0, n_pad - N), (0, fi_pad - F_in)))
    wt_p = jnp.pad(W.astype(jnp.float32).T,
                   ((0, fi_pad - F_in), (0, fo_pad - F_out)))
    adj_p = jnp.pad(adj.astype(jnp.float32),
                    ((0, n_pad - N), (0, n_pad - N)))

    grid_rows = n_pad // tm
    grid_red = n_pad // tk

    vmem_limit = 32 * 1024 * 1024
    mosaic_2d = pltpu.CompilerParams(
        dimension_semantics=("parallel", "arbitrary"),
        vmem_limit_bytes=vmem_limit)
    mosaic_1d = pltpu.CompilerParams(
        dimension_semantics=("parallel",),
        vmem_limit_bytes=vmem_limit)

    # -- Kernel 1: fused degree + int8 cast (one pass over f32 adj) ----------
    adj_i8, d = pl.pallas_call(
        _degree_cast_kernel,
        out_shape=(jax.ShapeDtypeStruct((n_pad, n_pad), jnp.int8),
                   jax.ShapeDtypeStruct((n_pad, 1), jnp.float32)),
        grid_spec=pltpu.PrefetchScalarGridSpec(
            num_scalar_prefetch=0,
            grid=(grid_rows, grid_red),
            in_specs=[pl.BlockSpec((tm, tk), lambda i, k: (i, k))],
            out_specs=[pl.BlockSpec((tm, tk), lambda i, k: (i, k)),
                       pl.BlockSpec((tm, 1), lambda i, k: (i, 0))],
            scratch_shapes=[pltpu.VMEM((tm, 1), jnp.float32)]),
        compiler_params=mosaic_2d,
    )(adj_p)

    # -- Kernel 2: X_s = d * (H @ W.T), bf16 ---------------------------------
    xs = pl.pallas_call(
        _xw_kernel,
        out_shape=jax.ShapeDtypeStruct((n_pad, fo_pad), jnp.bfloat16),
        grid_spec=pltpu.PrefetchScalarGridSpec(
            num_scalar_prefetch=0,
            grid=(grid_rows,),
            in_specs=[
                pl.BlockSpec((tm, fi_pad), lambda i: (i, 0)),
                pl.BlockSpec((fi_pad, fo_pad), lambda i: (0, 0)),
                pl.BlockSpec((tm, 1), lambda i: (i, 0)),
            ],
            out_specs=pl.BlockSpec((tm, fo_pad), lambda i: (i, 0))),
        compiler_params=mosaic_1d,
    )(h_p, wt_p, d)

    # -- Kernel 3: relu(d * (adj @ X_s + X_s)) -------------------------------
    # Keep X_s fully VMEM-resident when it fits (budgeted at 2x for the
    # input buffering, against the 32 MiB scoped limit / v7x 64 MiB VMEM).
    xs_bytes_one = n_pad * fo_pad * 2
    resident = 2 * xs_bytes_one <= 12 * 1024 * 1024

    if resident:
        kernel = _make_spmm_resident_kernel(tm, tk)
        in_specs = [
            pl.BlockSpec((tm, 1), lambda i, k: (i, 0)),        # d (rows)
            pl.BlockSpec((tm, tk), lambda i, k: (i, k)),       # adj int8 tile
            pl.BlockSpec((n_pad, fo_pad), lambda i, k: (0, 0)),  # X_s resident
        ]
        args = (d, adj_i8, xs)
        xs_hbm_bytes = xs_bytes_one
    else:
        kernel = _spmm_streamed_kernel
        in_specs = [
            pl.BlockSpec((tm, 1), lambda i, k: (i, 0)),        # d (rows)
            pl.BlockSpec((tm, tk), lambda i, k: (i, k)),       # adj int8 tile
            pl.BlockSpec((tm, fo_pad), lambda i, k: (i, 0)),   # X_s (+I term)
            pl.BlockSpec((tk, fo_pad), lambda i, k: (k, 0)),   # X_s (reduce)
        ]
        args = (d, adj_i8, xs, xs)
        xs_hbm_bytes = (1 + grid_rows) * xs_bytes_one

    cost = pl.CostEstimate(
        flops=2 * n_pad * n_pad * fo_pad + 3 * n_pad * fo_pad,
        transcendentals=0,
        bytes_accessed=(n_pad * n_pad            # adj (int8)
                        + xs_hbm_bytes           # X_s (bf16)
                        + n_pad * fo_pad * 4     # out
                        + n_pad * 4))            # d

    out_p = pl.pallas_call(
        kernel,
        out_shape=jax.ShapeDtypeStruct((n_pad, fo_pad), jnp.float32),
        grid_spec=pltpu.PrefetchScalarGridSpec(
            num_scalar_prefetch=0,
            grid=(grid_rows, grid_red),
            in_specs=in_specs,
            out_specs=pl.BlockSpec((tm, fo_pad), lambda i, k: (i, 0)),
            scratch_shapes=[pltpu.VMEM((tm, fo_pad), jnp.float32)]),
        compiler_params=mosaic_2d,
        cost_estimate=cost,
    )(*args)

    return out_p[:N, :F_out]


def gcn_ref(H, adj, W):
    """Pure-JAX reference mirroring the PyTorch forward."""
    n = adj.shape[0]
    a_hat = adj + jnp.eye(n, dtype=adj.dtype)
    degree = a_hat.sum(axis=1)
    d_is = jnp.power(degree, -0.5)
    d_is = jnp.where(jnp.isinf(d_is), 0.0, d_is)
    a_norm = a_hat * d_is[:, None] * d_is[None, :]
    return jnp.maximum(a_norm @ (H @ W.T), 0.0)


if __name__ == "__main__":
    key = jax.random.PRNGKey(0)
    k_h, k_adj, k_w = jax.random.split(key, 3)

    N, F_in, F_out = 8, 16, 32

    H = jax.random.normal(k_h, (N, F_in), dtype=jnp.float32)
    # symmetric 0/1 adjacency, no self loops
    a = (jax.random.uniform(k_adj, (N, N)) > 0.5).astype(jnp.float32)
    adj = jnp.triu(a, k=1)
    adj = adj + adj.T
    # nn.Linear weight shape [F_out, F_in]
    W = jax.random.normal(k_w, (F_out, F_in), dtype=jnp.float32) * 0.1

    gcn = jax.jit(functools.partial(gcn_layer))
    out = jax.block_until_ready(gcn(H, adj, W))

    ref = gcn_ref(H, adj, W)
    assert out.shape == (N, F_out)
    # X_s travels in bf16 (exact 0/1 adj products, ~2^-8 rounding on X_s),
    # so compare with a bf16-appropriate tolerance.
    assert jnp.allclose(out, ref, atol=2e-2, rtol=2e-2), "mismatch vs reference"

    print("KERNEL_OK")
</pallas_src>

<mosaic_0001>
module attributes {stable_mosaic.version = 11 : i64} {
  func.func @_degree_cast_kernel(%arg0: i32, %arg1: i32, %arg2: memref<128x128xf32, #tpu.memory_space<vmem>>, %arg3: memref<128x128xi8, #tpu.memory_space<vmem>>, %arg4: memref<128x1xf32, #tpu.memory_space<vmem>>, %arg5: memref<128x1xf32, #tpu.memory_space<vmem>>) attributes {dimension_semantics = [#tpu.dimension_semantics<parallel>, #tpu.dimension_semantics<arbitrary>], iteration_bounds = array<i64: 1, 1>, scalar_prefetch = 0 : i64, scratch_operands = 1 : i64, tpu.core_type = #tpu.core_type<tc>, window_params = [{transform_indices = @transform_0, window_bounds = array<i64: 128, 128>}, {transform_indices = @transform_1, window_bounds = array<i64: 128, 128>}, {transform_indices = @transform_2, window_bounds = array<i64: 128, 1>}]} {
    %c0_i32 = arith.constant 0 : i32
    %0 = arith.cmpi eq, %arg1, %c0_i32 : i32
    %1 = arith.extui %0 : i1 to i32
    %c0_i32_0 = arith.constant 0 : i32
    %2 = arith.cmpi ne, %1, %c0_i32_0 : i32
    scf.if %2 {
      %cst_10 = arith.constant 0.000000e+00 : f32
      %14 = vector.broadcast %cst_10 : f32 to vector<128x1xf32>
      %c0_11 = arith.constant 0 : index
      %c0_12 = arith.constant 0 : index
      %15 = vector.load %arg5[%c0_11, %c0_12] : memref<128x1xf32, #tpu.memory_space<vmem>>, vector<128x1xf32>
      tpu.vector_store %arg5[%c0_11, %c0_12], %14 {strides = array<i32>} : memref<128x1xf32, #tpu.memory_space<vmem>>, vector<128x1xf32>,
    } else {
    }
    %c0 = arith.constant 0 : index
    %c0_1 = arith.constant 0 : index
    %3 = vector.load %arg2[%c0, %c0_1] : memref<128x128xf32, #tpu.memory_space<vmem>>, vector<128x128xf32>
    %4 = arith.fptosi %3 : vector<128x128xf32> to vector<128x128xi8>
    %c0_2 = arith.constant 0 : index
    %c0_3 = arith.constant 0 : index
    %5 = vector.load %arg3[%c0_2, %c0_3] : memref<128x128xi8, #tpu.memory_space<vmem>>, vector<128x128xi8>
    tpu.vector_store %arg3[%c0_2, %c0_3], %4 {strides = array<i32>} : memref<128x128xi8, #tpu.memory_space<vmem>>, vector<128x128xi8>,
    %c0_4 = arith.constant 0 : index
    %c0_5 = arith.constant 0 : index
    %6 = vector.load %arg5[%c0_4, %c0_5] : memref<128x1xf32, #tpu.memory_space<vmem>>, vector<128x1xf32>
    %cst = arith.constant dense<0.000000e+00> : vector<128xf32>
    %7 = vector.multi_reduction <add>, %3, %cst [1] : vector<128x128xf32> to vector<128xf32>
    %8 = vector.shape_cast %7 : vector<128xf32> to vector<128x1xf32>
    %9 = arith.addf %6, %8 : vector<128x1xf32>
    %c0_6 = arith.constant 0 : index
    %c0_7 = arith.constant 0 : index
    %10 = vector.load %arg5[%c0_6, %c0_7] : memref<128x1xf32, #tpu.memory_space<vmem>>, vector<128x1xf32>
    tpu.vector_store %arg5[%c0_6, %c0_7], %9 {strides = array<i32>} : memref<128x1xf32, #tpu.memory_space<vmem>>, vector<128x1xf32>,
    %c0_i32_8 = arith.constant 0 : i32
    %11 = arith.cmpi eq, %arg1, %c0_i32_8 : i32
    %12 = arith.extui %11 : i1 to i32
    %c0_i32_9 = arith.constant 0 : i32
    %13 = arith.cmpi ne, %12, %c0_i32_9 : i32
    scf.if %13 {
      %c0_10 = arith.constant 0 : index
      %c0_11 = arith.constant 0 : index
      %14 = vector.load %arg5[%c0_10, %c0_11] : memref<128x1xf32, #tpu.memory_space<vmem>>, vector<128x1xf32>
      %cst_12 = arith.constant 1.000000e+00 : f32
      %15 = vector.broadcast %cst_12 : f32 to vector<128x1xf32>
      %16 = arith.addf %14, %15 : vector<128x1xf32>
      %17 = math.rsqrt %16 : vector<128x1xf32>
      %c0_13 = arith.constant 0 : index
      %c0_14 = arith.constant 0 : index
      %18 = vector.load %arg4[%c0_13, %c0_14] : memref<128x1xf32, #tpu.memory_space<vmem>>, vector<128x1xf32>
      tpu.vector_store %arg4[%c0_13, %c0_14], %17 {strides = array<i32>} : memref<128x1xf32, #tpu.memory_space<vmem>>, vector<128x1xf32>,
    } else {
    }
    return
  }
  func.func @transform_0(%arg0: i32, %arg1: i32) -> (i32, i32) {
    %c0_i32 = arith.constant 0 : i32
    return %arg0, %arg1 : i32, i32
  }
  func.func @transform_1(%arg0: i32, %arg1: i32) -> (i32, i32) {
    %c0_i32 = arith.constant 0 : i32
    return %arg0, %arg1 : i32, i32
  }
  func.func @transform_2(%arg0: i32, %arg1: i32) -> (i32, i32) {
    %c0_i32 = arith.constant 0 : i32
    %c0_i32_0 = arith.constant 0 : i32
    return %arg0, %c0_i32 : i32, i32
  }
}

module attributes {stable_mosaic.version = 11 : i64} {
  func.func @_xw_kernel(%arg0: i32, %arg1: memref<128x128xf32, #tpu.memory_space<vmem>>, %arg2: memref<128x128xf32, #tpu.memory_space<vmem>>, %arg3: memref<128x1xf32, #tpu.memory_space<vmem>>, %arg4: memref<128x128xbf16, #tpu.memory_space<vmem>>) attributes {dimension_semantics = [#tpu.dimension_semantics<parallel>], iteration_bounds = array<i64: 1>, scalar_prefetch = 0 : i64, scratch_operands = 0 : i64, tpu.core_type = #tpu.core_type<tc>, window_params = [{transform_indices = @transform_0, window_bounds = array<i64: 128, 128>}, {pipeline_mode = #tpu.pipeline_mode<synchronous>, transform_indices = @transform_1, window_bounds = array<i64: 128, 128>}, {transform_indices = @transform_2, window_bounds = array<i64: 128, 1>}, {transform_indices = @transform_3, window_bounds = array<i64: 128, 128>}]} {
    %c0 = arith.constant 0 : index
    %c0_0 = arith.constant 0 : index
    %0 = vector.load %arg1[%c0, %c0_0] : memref<128x128xf32, #tpu.memory_space<vmem>>, vector<128x128xf32>
    %c0_1 = arith.constant 0 : index
    %c0_2 = arith.constant 0 : index
    %1 = vector.load %arg2[%c0_1, %c0_2] : memref<128x128xf32, #tpu.memory_space<vmem>>, vector<128x128xf32>
    %cst = arith.constant dense<0.000000e+00> : vector<128x128xf32>
    %2 = tpu.matmul %0, %1, %cst {dimension_numbers = #tpu.dot_dimension_numbers<[1], [0], [0], [1], [0, 0, 1, 1], [], []>} : vector<128x128xf32>, vector<128x128xf32>, vector<128x128xf32> -> vector<128x128xf32>
    %c0_3 = arith.constant 0 : index
    %c0_4 = arith.constant 0 : index
    %3 = vector.load %arg3[%c0_3, %c0_4] : memref<128x1xf32, #tpu.memory_space<vmem>>, vector<128x1xf32>
    %4 = vector.broadcast %3 : vector<128x1xf32> to vector<128x128xf32>
    %5 = arith.mulf %2, %4 : vector<128x128xf32>
    %6 = arith.truncf %5 : vector<128x128xf32> to vector<128x128xbf16>
    %c0_5 = arith.constant 0 : index
    %c0_6 = arith.constant 0 : index
    %7 = vector.load %arg4[%c0_5, %c0_6] : memref<128x128xbf16, #tpu.memory_space<vmem>>, vector<128x128xbf16>
    tpu.vector_store %arg4[%c0_5, %c0_6], %6 {strides = array<i32>} : memref<128x128xbf16, #tpu.memory_space<vmem>>, vector<128x128xbf16>,
    return
  }
  func.func @transform_0(%arg0: i32) -> (i32, i32) {
    %c0_i32 = arith.constant 0 : i32
    %c0_i32_0 = arith.constant 0 : i32
    return %arg0, %c0_i32 : i32, i32
  }
  func.func @transform_1(%arg0: i32) -> (i32, i32) {
    %c0_i32 = arith.constant 0 : i32
    %c0_i32_0 = arith.constant 0 : i32
    %c0_i32_1 = arith.constant 0 : i32
    return %c0_i32, %c0_i32_0 : i32, i32
  }
  func.func @transform_2(%arg0: i32) -> (i32, i32) {
    %c0_i32 = arith.constant 0 : i32
    %c0_i32_0 = arith.constant 0 : i32
    return %arg0, %c0_i32 : i32, i32
  }
  func.func @transform_3(%arg0: i32) -> (i32, i32) {
    %c0_i32 = arith.constant 0 : i32
    %c0_i32_0 = arith.constant 0 : i32
    return %arg0, %c0_i32 : i32, i32
  }
}

module attributes {stable_mosaic.version = 11 : i64} {
  func.func @kernel(%arg0: i32, %arg1: i32, %arg2: memref<128x1xf32, #tpu.memory_space<vmem>>, %arg3: memref<128x128xi8, #tpu.memory_space<vmem>>, %arg4: memref<128x128xbf16, #tpu.memory_space<vmem>>, %arg5: memref<128x128xf32, #tpu.memory_space<vmem>>, %arg6: memref<128x128xf32, #tpu.memory_space<vmem>>) attributes {dimension_semantics = [#tpu.dimension_semantics<parallel>, #tpu.dimension_semantics<arbitrary>], iteration_bounds = array<i64: 1, 1>, scalar_prefetch = 0 : i64, scratch_operands = 1 : i64, tpu.core_type = #tpu.core_type<tc>, window_params = [{transform_indices = @transform_0, window_bounds = array<i64: 128, 1>}, {transform_indices = @transform_1, window_bounds = array<i64: 128, 128>}, {pipeline_mode = #tpu.pipeline_mode<synchronous>, transform_indices = @transform_2, window_bounds = array<i64: 128, 128>}, {transform_indices = @transform_3, window_bounds = array<i64: 128, 128>}]} {
    %c0_i32 = arith.constant 0 : i32
    %0 = arith.cmpi eq, %arg1, %c0_i32 : i32
    %1 = arith.extui %0 : i1 to i32
    %c0_i32_0 = arith.constant 0 : i32
    %2 = arith.cmpi ne, %1, %c0_i32_0 : i32
    scf.if %2 {
      %c128_i32_9 = arith.constant 128 : i32
      %16 = arith.muli %arg0, %c128_i32_9 : i32
      %17 = tpu.assume_multiple %16, 128 : i32
      %18 = arith.index_cast %17 : i32 to index
      %c0_10 = arith.constant 0 : index
      %19 = vector.load %arg4[%18, %c0_10] : memref<128x128xbf16, #tpu.memory_space<vmem>>, vector<128x128xbf16>
      %20 = arith.extf %19 : vector<128x128xbf16> to vector<128x128xf32>
      %c0_11 = arith.constant 0 : index
      %c0_12 = arith.constant 0 : index
      %21 = vector.load %arg6[%c0_11, %c0_12] : memref<128x128xf32, #tpu.memory_space<vmem>>, vector<128x128xf32>
      tpu.vector_store %arg6[%c0_11, %c0_12], %20 {strides = array<i32>} : memref<128x128xf32, #tpu.memory_space<vmem>>, vector<128x128xf32>,
    } else {
    }
    %c128_i32 = arith.constant 128 : i32
    %3 = arith.muli %arg1, %c128_i32 : i32
    %4 = tpu.assume_multiple %3, 128 : i32
    %c0 = arith.constant 0 : index
    %c0_1 = arith.constant 0 : index
    %5 = vector.load %arg6[%c0, %c0_1] : memref<128x128xf32, #tpu.memory_space<vmem>>, vector<128x128xf32>
    %c0_2 = arith.constant 0 : index
    %c0_3 = arith.constant 0 : index
    %6 = vector.load %arg3[%c0_2, %c0_3] : memref<128x128xi8, #tpu.memory_space<vmem>>, vector<128x128xi8>
    %7 = arith.sitofp %6 : vector<128x128xi8> to vector<128x128xbf16>
    %8 = arith.index_cast %4 : i32 to index
    %c0_4 = arith.constant 0 : index
    %9 = vector.load %arg4[%8, %c0_4] : memref<128x128xbf16, #tpu.memory_space<vmem>>, vector<128x128xbf16>
    %cst = arith.constant dense<0.000000e+00> : vector<128x128xf32>
    %10 = tpu.matmul %7, %9, %cst {dimension_numbers = #tpu.dot_dimension_numbers<[1], [0], [0], [1], [0, 0, 1, 1], [], []>} : vector<128x128xbf16>, vector<128x128xbf16>, vector<128x128xf32> -> vector<128x128xf32>
    %11 = arith.addf %5, %10 : vector<128x128xf32>
    %c0_5 = arith.constant 0 : index
    %c0_6 = arith.constant 0 : index
    %12 = vector.load %arg6[%c0_5, %c0_6] : memref<128x128xf32, #tpu.memory_space<vmem>>, vector<128x128xf32>
    tpu.vector_store %arg6[%c0_5, %c0_6], %11 {strides = array<i32>} : memref<128x128xf32, #tpu.memory_space<vmem>>, vector<128x128xf32>,
    %c0_i32_7 = arith.constant 0 : i32
    %13 = arith.cmpi eq, %arg1, %c0_i32_7 : i32
    %14 = arith.extui %13 : i1 to i32
    %c0_i32_8 = arith.constant 0 : i32
    %15 = arith.cmpi ne, %14, %c0_i32_8 : i32
    scf.if %15 {
      %c0_9 = arith.constant 0 : index
      %c0_10 = arith.constant 0 : index
      %16 = vector.load %arg6[%c0_9, %c0_10] : memref<128x128xf32, #tpu.memory_space<vmem>>, vector<128x128xf32>
      %c0_11 = arith.constant 0 : index
      %c0_12 = arith.constant 0 : index
      %17 = vector.load %arg2[%c0_11, %c0_12] : memref<128x1xf32, #tpu.memory_space<vmem>>, vector<128x1xf32>
      %18 = vector.broadcast %17 : vector<128x1xf32> to vector<128x128xf32>
      %19 = arith.mulf %16, %18 : vector<128x128xf32>
      %cst_13 = arith.constant 0.000000e+00 : f32
      %20 = vector.broadcast %cst_13 : f32 to vector<128x128xf32>
      %21 = arith.maximumf %19, %20 : vector<128x128xf32>
      %c0_14 = arith.constant 0 : index
      %c0_15 = arith.constant 0 : index
      %22 = vector.load %arg5[%c0_14, %c0_15] : memref<128x128xf32, #tpu.memory_space<vmem>>, vector<128x128xf32>
      tpu.vector_store %arg5[%c0_14, %c0_15], %21 {strides = array<i32>} : memref<128x128xf32, #tpu.memory_space<vmem>>, vector<128x128xf32>,
    } else {
    }
    return
  }
  func.func @transform_0(%arg0: i32, %arg1: i32) -> (i32, i32) {
    %c0_i32 = arith.constant 0 : i32
    %c0_i32_0 = arith.constant 0 : i32
    return %arg0, %c0_i32 : i32, i32
  }
  func.func @transform_1(%arg0: i32, %arg1: i32) -> (i32, i32) {
    %c0_i32 = arith.constant 0 : i32
    return %arg0, %arg1 : i32, i32
  }
  func.func @transform_2(%arg0: i32, %arg1: i32) -> (i32, i32) {
    %c0_i32 = arith.constant 0 : i32
    %c0_i32_0 = arith.constant 0 : i32
    %c0_i32_1 = arith.constant 0 : i32
    return %c0_i32, %c0_i32_0 : i32, i32
  }
  func.func @transform_3(%arg0: i32, %arg1: i32) -> (i32, i32) {
    %c0_i32 = arith.constant 0 : i32
    %c0_i32_0 = arith.constant 0 : i32
    return %arg0, %c0_i32 : i32, i32
  }
}

</mosaic_0001>

<bundles_post_ra>
// kernel: gcn_layer.3
= control target key start
LH: loop header
LB: loop body
LE: loop exit
PB: predicated region body
PF: predicated region fallthrough
CT: control target
= control target key end

     0   :  { %vm14_vm0 = vcmask 7168   ;;  %v332_v3 = vmov 0.0   ;;  %s504_s0 = inlined_call_operand.vmem [shape: f32[128,128], index: 0, kind: input, shape index: {}]   ;;  %s505_s1 = inlined_call_operand.vmem [shape: s8[128,128], index: 1, kind: output, shape index: {0}]   ;;  %s506_s2 = inlined_call_operand.vmem [shape: f32[128,1], index: 2, kind: output, shape index: {1}]  }
   0x1   :  { %v33_v0 = vld [vmem:[%s504_s0 + $0x10] sm:$0xff]  ;;  %v31_v1 = vld [vmem:[%s504_s0] sm:$0xff]  ;;  %v34_v2 = vld [vmem:[%s504_s0 + $0x18] sm:$0xff]  ;;  %17 = vst.msk [vmem:[#allocation2 + $0x10] sm:$0xff] %vm14_vm0, %v332_v3 }
   0x2   :  { %15 = vst.msk [vmem:[#allocation2] sm:$0xff] %vm14_vm0, %v332_v3  ;;  %16 = vst.msk [vmem:[#allocation2 + $0x8] sm:$0xff] %vm14_vm0, %v332_v3  ;;  %131 = vadd.xlane.f32.xlu1 %v33_v0  ;;  %v49_v4 = vmax.f32 %v33_v0, -128.0  ;;  %127 = vadd.xlane.f32.xlu0 %v31_v1  ;;  %v47_v5 = vmax.f32 %v31_v1, -128.0  ;;  %v50_v6 = vmax.f32 %v34_v2, -128.0  ;;  %v32_v7 = vld [vmem:[%s504_s0 + $0x8] sm:$0xff] }
   0x3   :  { %18 = vst.msk [vmem:[#allocation2 + $0x18] sm:$0xff] %vm14_vm0, %v332_v3  ;;  %19 = vst.msk [vmem:[#allocation2 + $0x20] sm:$0xff] %vm14_vm0, %v332_v3  ;;  %v36_v8 = vld [vmem:[%s504_s0 + $0x28] sm:$0xff]  ;;  %v35_v9 = vld [vmem:[%s504_s0 + $0x20] sm:$0xff]  ;;  %v48_v10 = vmax.f32 %v32_v7, -128.0 }
   0x4   :  { %20 = vst.msk [vmem:[#allocation2 + $0x28] sm:$0xff] %vm14_vm0, %v332_v3  ;;  %21 = vst.msk [vmem:[#allocation2 + $0x30] sm:$0xff] %vm14_vm0, %v332_v3  ;;  %v52_v11 = vmax.f32 %v36_v8, -128.0  ;;  %v51_v12 = vmax.f32 %v35_v9, -128.0  ;;  %v38_v13 = vld [vmem:[%s504_s0 + $0x38] sm:$0xff]  ;;  %v65_v14 = vmin.f32 %v49_v4, 127.0 }
   0x5   :  { %22 = vst.msk [vmem:[#allocation2 + $0x38] sm:$0xff] %vm14_vm0, %v332_v3  ;;  %23 = vst.msk [vmem:[#allocation2 + $0x40] sm:$0xff] %vm14_vm0, %v332_v3  ;;  %v63_v15 = vmin.f32 %v47_v5, 127.0  ;;  %v66_v16 = vmin.f32 %v50_v6, 127.0  ;;  %v54_v17 = vmax.f32 %v38_v13, -128.0  ;;  %v37_v18 = vld [vmem:[%s504_s0 + $0x30] sm:$0xff] }
   0x6   :  { %24 = vst.msk [vmem:[#allocation2 + $0x48] sm:$0xff] %vm14_vm0, %v332_v3  ;;  %25 = vst.msk [vmem:[#allocation2 + $0x50] sm:$0xff] %vm14_vm0, %v332_v3  ;;  %v64_v19 = vmin.f32 %v48_v10, 127.0  ;;  %v68_v20 = vmin.f32 %v52_v11, 127.0  ;;  %v67_v21 = vmin.f32 %v51_v12, 127.0  ;;  %v53_v22 = vmax.f32 %v37_v18, -128.0  ;;  %133 = vadd.xlane.f32.xlu1 %v34_v2  ;;  %129 = vadd.xlane.f32.xlu0 %v32_v7 }
   0x7   :  { %26 = vst.msk [vmem:[#allocation2 + $0x58] sm:$0xff] %vm14_vm0, %v332_v3  ;;  %27 = vst.msk [vmem:[#allocation2 + $0x60] sm:$0xff] %vm14_vm0, %v332_v3  ;;  %v271_v23 = vtrunc.f32 %v65_v14  ;;  %v267_v24 = vtrunc.f32 %v63_v15  ;;  %v273_v25 = vtrunc.f32 %v66_v16  ;;  %v70_v26 = vmin.f32 %v54_v17, 127.0  ;;  %v40_v39 = vld [vmem:[%s504_s0 + $0x48] sm:$0xff]  ;;  %v39_v40 = vld [vmem:[%s504_s0 + $0x40] sm:$0xff] }
   0x8   :  { %28 = vst.msk [vmem:[#allocation2 + $0x68] sm:$0xff] %vm14_vm0, %v332_v3  ;;  %29 = vst.msk [vmem:[#allocation2 + $0x70] sm:$0xff] %vm14_vm0, %v332_v3  ;;  %v269_v27 = vtrunc.f32 %v64_v19  ;;  %v277_v28 = vtrunc.f32 %v68_v20  ;;  %v275_v29 = vtrunc.f32 %v67_v21  ;;  %v69_v30 = vmin.f32 %v53_v22, 127.0  ;;  %v42_v45 = vld [vmem:[%s504_s0 + $0x58] sm:$0xff]  ;;  %v41_v50 = vld [vmem:[%s504_s0 + $0x50] sm:$0xff] }
   0x9   :  { %30 = vst.msk [vmem:[#allocation2 + $0x78] sm:$0xff] %vm14_vm0, %v332_v3  ;;  %v272_v31 = vcvt.f32.s32 %v271_v23  ;;  %v268_v32 = vcvt.f32.s32 %v267_v24  ;;  %v274_v33 = vcvt.f32.s32 %v273_v25  ;;  %v281_v34 = vtrunc.f32 %v70_v26  ;;  %v44_v51 = vld [vmem:[%s504_s0 + $0x68] sm:$0xff]  ;;  %v43_v56 = vld [vmem:[%s504_s0 + $0x60] sm:$0xff]  ;;  %v46_v1 = vld [vmem:[%s504_s0 + $0x78] sm:$0xff] }
   0xa   :  { %v270_v35 = vcvt.f32.s32 %v269_v27  ;;  %v278_v36 = vcvt.f32.s32 %v277_v28  ;;  %v276_v37 = vcvt.f32.s32 %v275_v29  ;;  %v279_v38 = vtrunc.f32 %v69_v30  ;;  %137 = vadd.xlane.f32.xlu1 %v36_v8  ;;  %135 = vadd.xlane.f32.xlu0 %v35_v9  ;;  %v45_v10 = vld [vmem:[%s504_s0 + $0x70] sm:$0xff]  ;;  %v111_v30 = vld [vmem:[#allocation2] sm:$0xff] }
   0xb   :  { %v96_v41 = vpack.c.b16 %v274_v33, %v272_v31  ;;  %v282_v42 = vcvt.f32.s32 %v281_v34  ;;  %v56_v43 = vmax.f32 %v40_v39, -128.0  ;;  %v55_v44 = vmax.f32 %v39_v40, -128.0  ;;  %v113_v29 = vld [vmem:[#allocation2 + $0x10] sm:$0xff] }
   0xc   :  { %v95_v46 = vpack.c.b16 %v270_v35, %v268_v32  ;;  %v98_v47 = vpack.c.b16 %v278_v36, %v276_v37  ;;  %v280_v48 = vcvt.f32.s32 %v279_v38  ;;  %v58_v49 = vmax.f32 %v42_v45, -128.0  ;;  %v114_v35 = vld [vmem:[#allocation2 + $0x18] sm:$0xff]  ;;  %v112_v36 = vld [vmem:[#allocation2 + $0x8] sm:$0xff] }
   0xd   :  { %v72_v52 = vmin.f32 %v56_v43, 127.0  ;;  %v71_v53 = vmin.f32 %v55_v44, 127.0  ;;  %v57_v54 = vmax.f32 %v41_v50, -128.0  ;;  %v60_v55 = vmax.f32 %v44_v51, -128.0 }
   0xe   :  { %v97_v57 = vpack.c.b8 %v96_v41, %v95_v46  ;;  %v99_v58 = vpack.c.b16 %v282_v42, %v280_v48  ;;  %v74_v59 = vmin.f32 %v58_v49, 127.0  ;;  %v59_v60 = vmax.f32 %v43_v56, -128.0  ;;  %141 = vadd.xlane.f32.xlu1 %v38_v13  ;;  %139 = vadd.xlane.f32.xlu0 %v37_v18  ;;  %v116_v41 = vld [vmem:[#allocation2 + $0x28] sm:$0xff]  ;;  %v115_v42 = vld [vmem:[#allocation2 + $0x20] sm:$0xff] }
   0xf   :  { %v285_v61 = vtrunc.f32 %v72_v52  ;;  %v283_v62 = vtrunc.f32 %v71_v53  ;;  %v73_v63 = vmin.f32 %v57_v54, 127.0  ;;  %v76_v0 = vmin.f32 %v60_v55, 127.0 }
  0x10   :  { %107 = vst [vmem:[%s505_s1] sm:$0xff] %v97_v57  ;;  %v100_v2 = vpack.c.b8 %v99_v58, %v98_v47  ;;  %v289_v3 = vtrunc.f32 %v74_v59  ;;  %v75_v4 = vmin.f32 %v59_v60, 127.0  ;;  %v62_v5 = vmax.f32 %v46_v1, -128.0  ;;  %v118_v47 = vld [vmem:[#allocation2 + $0x38] sm:$0xff]  ;;  %v120_v57 = vld [vmem:[#allocation2 + $0x48] sm:$0xff]  ;;  %v119_v60 = vld [vmem:[#allocation2 + $0x40] sm:$0xff] }
  0x11   :  { %v286_v6 = vcvt.f32.s32 %v285_v61  ;;  %v284_v7 = vcvt.f32.s32 %v283_v62  ;;  %v287_v8 = vtrunc.f32 %v73_v63  ;;  %v293_v9 = vtrunc.f32 %v76_v0 }
  0x12   :  { %108 = vst [vmem:[%s505_s1 + $0x8] sm:$0xff] %v100_v2  ;;  %v290_v11 = vcvt.f32.s32 %v289_v3  ;;  %v291_v12 = vtrunc.f32 %v75_v4  ;;  %v78_v13 = vmin.f32 %v62_v5, 127.0  ;;  %v61_v14 = vmax.f32 %v45_v10, -128.0  ;;  %145 = vadd.xlane.f32.xlu1 %v40_v39  ;;  %143 = vadd.xlane.f32.xlu0 %v39_v40  ;;  %v122_v3 = vld [vmem:[#allocation2 + $0x58] sm:$0xff] }
  0x13   :  { %v101_v15 = vpack.c.b16 %v286_v6, %v284_v7  ;;  %v288_v16 = vcvt.f32.s32 %v287_v8  ;;  %v294_v17 = vcvt.f32.s32 %v293_v9  ;;  %v121_v6 = vld [vmem:[#allocation2 + $0x50] sm:$0xff] }
  0x14   :  { %v292_v18 = vcvt.f32.s32 %v291_v12  ;;  %v297_v19 = vtrunc.f32 %v78_v13  ;;  %v77_v20 = vmin.f32 %v61_v14, 127.0  ;;  %v124_v13 = vld [vmem:[#allocation2 + $0x68] sm:$0xff] }
  0x15   :  { %v102_v21 = vpack.c.b16 %v290_v11, %v288_v16  ;;  %v123_v16 = vld [vmem:[#allocation2 + $0x60] sm:$0xff] }
  0x16   :  { %v298_v22 = vcvt.f32.s32 %v297_v19  ;;  %v295_v23 = vtrunc.f32 %v77_v20  ;;  %149 = vadd.xlane.f32.xlu1 %v42_v45  ;;  %147 = vadd.xlane.f32.xlu0 %v41_v50  ;;  %v104_v25 = vpack.c.b16 %v294_v17, %v292_v18  ;;  %v117_v50 = vld [vmem:[#allocation2 + $0x30] sm:$0xff] }
  0x17   :  { %v103_v24 = vpack.c.b8 %v102_v21, %v101_v15 }
  0x18   :  { %v296_v26 = vcvt.f32.s32 %v295_v23  ;;  %v126_v23 = vld [vmem:[#allocation2 + $0x78] sm:$0xff] }
  0x19   :  { %109 = vst [vmem:[%s505_s1 + $0x10] sm:$0xff] %v103_v24 }
  0x1a   :  { %v105_v27 = vpack.c.b16 %v298_v22, %v296_v26  ;;  %153 = vadd.xlane.f32.xlu1 %v44_v51  ;;  %151 = vadd.xlane.f32.xlu0 %v43_v56 }
  0x1c   :  { %v106_v28 = vpack.c.b8 %v105_v27, %v104_v25  ;;  %v125_v27 = vld [vmem:[#allocation2 + $0x70] sm:$0xff] }
  0x1e   :  { %110 = vst [vmem:[%s505_s1 + $0x18] sm:$0xff] %v106_v28  ;;  %157 = vadd.xlane.f32.xlu1 %v46_v1  ;;  %155 = vadd.xlane.f32.xlu0 %v45_v10 }
  0x8b   :  { %v132_v31 = vpop.xlane.xlu1 %131  ;;  %v128_v32 = vpop.xlane.xlu0 %127 }
  0x8c   :  { %v161_v33 = vadd.f32 %v132_v31, %v113_v29  ;;  %v159_v34 = vadd.f32 %v128_v32, %v111_v30 }
  0x8e   :  { %178 = vst.msk [vmem:[#allocation2 + $0x10] sm:$0xff] %vm14_vm0, %v161_v33  ;;  %176 = vst.msk [vmem:[#allocation2] sm:$0xff] %vm14_vm0, %v159_v34 }
  0x8f   :  { %v134_v37 = vpop.xlane.xlu1 %133  ;;  %v130_v38 = vpop.xlane.xlu0 %129 }
  0x90   :  { %v162_v39 = vadd.f32 %v134_v37, %v114_v35  ;;  %v160_v40 = vadd.f32 %v130_v38, %v112_v36 }
  0x92   :  { %179 = vst.msk [vmem:[#allocation2 + $0x18] sm:$0xff] %vm14_vm0, %v162_v39  ;;  %177 = vst.msk [vmem:[#allocation2 + $0x8] sm:$0xff] %vm14_vm0, %v160_v40 }
  0x93   :  { %v138_v43 = vpop.xlane.xlu1 %137  ;;  %v136_v44 = vpop.xlane.xlu0 %135 }
  0x94   :  { %v164_v45 = vadd.f32 %v138_v43, %v116_v41  ;;  %v163_v46 = vadd.f32 %v136_v44, %v115_v42 }
  0x95   :  { %v197_v48 = vld [vmem:[#allocation2 + $0x10] sm:$0xff]  ;;  %v195_v49 = vld [vmem:[#allocation2] sm:$0xff] }
  0x96   :  { %v213_v51 = vadd.f32 1.0, %v197_v48  ;;  %v211_v52 = vadd.f32 1.0, %v195_v49  ;;  %181 = vst.msk [vmem:[#allocation2 + $0x28] sm:$0xff] %vm14_vm0, %v164_v45  ;;  %180 = vst.msk [vmem:[#allocation2 + $0x20] sm:$0xff] %vm14_vm0, %v163_v46 }
  0x97   :  { %v142_v53 = vpop.xlane.xlu1 %141  ;;  %v140_v54 = vpop.xlane.xlu0 %139 }
  0x98   :  { %300 = vrsqrt.f32 %v213_v51  ;;  %v166_v55 = vadd.f32 %v142_v53, %v118_v47  ;;  %v165_v56 = vadd.f32 %v140_v54, %v117_v50 }
  0x99   :  { %302 = vrsqrt.f32 %v211_v52  ;;  %v198_v58 = vld [vmem:[#allocation2 + $0x18] sm:$0xff]  ;;  %v196_v59 = vld [vmem:[#allocation2 + $0x8] sm:$0xff] }
  0x9a   :  { %v214_v61 = vadd.f32 1.0, %v198_v58  ;;  %v212_v62 = vadd.f32 1.0, %v196_v59  ;;  %183 = vst.msk [vmem:[#allocation2 + $0x38] sm:$0xff] %vm14_vm0, %v166_v55  ;;  %182 = vst.msk [vmem:[#allocation2 + $0x30] sm:$0xff] %vm14_vm0, %v165_v56 }
  0x9b   :  { %v146_v63 = vpop.xlane.xlu1 %145  ;;  %v144_v0 = vpop.xlane.xlu0 %143 }
  0x9c   :  { %304 = vrsqrt.f32 %v214_v61  ;;  %v168_v1 = vadd.f32 %v146_v63, %v120_v57  ;;  %v167_v2 = vadd.f32 %v144_v0, %v119_v60 }
  0x9d   :  { %306 = vrsqrt.f32 %v212_v62  ;;  %v200_v4 = vld [vmem:[#allocation2 + $0x28] sm:$0xff]  ;;  %v199_v5 = vld [vmem:[#allocation2 + $0x20] sm:$0xff] }
  0x9e   :  { %v216_v7 = vadd.f32 1.0, %v200_v4  ;;  %v215_v8 = vadd.f32 1.0, %v199_v5  ;;  %185 = vst.msk [vmem:[#allocation2 + $0x48] sm:$0xff] %vm14_vm0, %v168_v1  ;;  %184 = vst.msk [vmem:[#allocation2 + $0x40] sm:$0xff] %vm14_vm0, %v167_v2 }
  0x9f   :  { %v150_v9 = vpop.xlane.xlu1 %149  ;;  %v148_v10 = vpop.xlane.xlu0 %147 }
  0xa0   :  { %308 = vrsqrt.f32 %v216_v7  ;;  %v170_v11 = vadd.f32 %v150_v9, %v122_v3  ;;  %v169_v12 = vadd.f32 %v148_v10, %v121_v6 }
  0xa1   :  { %310 = vrsqrt.f32 %v215_v8  ;;  %v202_v14 = vld [vmem:[#allocation2 + $0x38] sm:$0xff]  ;;  %v201_v15 = vld [vmem:[#allocation2 + $0x30] sm:$0xff] }
  0xa2   :  { %v218_v17 = vadd.f32 1.0, %v202_v14  ;;  %v217_v18 = vadd.f32 1.0, %v201_v15  ;;  %187 = vst.msk [vmem:[#allocation2 + $0x58] sm:$0xff] %vm14_vm0, %v170_v11  ;;  %186 = vst.msk [vmem:[#allocation2 + $0x50] sm:$0xff] %vm14_vm0, %v169_v12 }
  0xa3   :  { %v154_v19 = vpop.xlane.xlu1 %153  ;;  %v152_v20 = vpop.xlane.xlu0 %151 }
  0xa4   :  { %312 = vrsqrt.f32 %v218_v17  ;;  %v172_v21 = vadd.f32 %v154_v19, %v124_v13  ;;  %v171_v22 = vadd.f32 %v152_v20, %v123_v16 }
  0xa5   :  { %v301_v24 = vpop.eup %300  ;;  %314 = vrsqrt.f32 %v217_v18  ;;  %v204_v25 = vld [vmem:[#allocation2 + $0x48] sm:$0xff]  ;;  %v203_v26 = vld [vmem:[#allocation2 + $0x40] sm:$0xff] }
  0xa6   :  { %v303_v28 = vpop.eup %302  ;;  %245 = vst.msk [vmem:[%s506_s2 + $0x10] sm:$0xff] %vm14_vm0, %v301_v24  ;;  %v220_v29 = vadd.f32 1.0, %v204_v25  ;;  %v219_v30 = vadd.f32 1.0, %v203_v26  ;;  %189 = vst.msk [vmem:[#allocation2 + $0x68] sm:$0xff] %vm14_vm0, %v172_v21 }
  0xa7   :  { %188 = vst.msk [vmem:[#allocation2 + $0x60] sm:$0xff] %vm14_vm0, %v171_v22  ;;  %243 = vst.msk [vmem:[%s506_s2] sm:$0xff] %vm14_vm0, %v303_v28  ;;  %v158_v31 = vpop.xlane.xlu1 %157  ;;  %v156_v32 = vpop.xlane.xlu0 %155 }
  0xa8   :  { %316 = vrsqrt.f32 %v220_v29  ;;  %v174_v33 = vadd.f32 %v158_v31, %v126_v23  ;;  %v173_v34 = vadd.f32 %v156_v32, %v125_v27 }
  0xa9   :  { %v305_v35 = vpop.eup %304  ;;  %318 = vrsqrt.f32 %v219_v30  ;;  %v206_v36 = vld [vmem:[#allocation2 + $0x58] sm:$0xff]  ;;  %v205_v37 = vld [vmem:[#allocation2 + $0x50] sm:$0xff] }
  0xaa   :  { %v307_v38 = vpop.eup %306  ;;  %246 = vst.msk [vmem:[%s506_s2 + $0x18] sm:$0xff] %vm14_vm0, %v305_v35  ;;  %v222_v39 = vadd.f32 1.0, %v206_v36  ;;  %v221_v40 = vadd.f32 1.0, %v205_v37  ;;  %191 = vst.msk [vmem:[#allocation2 + $0x78] sm:$0xff] %vm14_vm0, %v174_v33 }
  0xab   :  { %190 = vst.msk [vmem:[#allocation2 + $0x70] sm:$0xff] %vm14_vm0, %v173_v34  ;;  %244 = vst.msk [vmem:[%s506_s2 + $0x8] sm:$0xff] %vm14_vm0, %v307_v38 }
  0xac   :  { %320 = vrsqrt.f32 %v222_v39 }
  0xad   :  { %v309_v41 = vpop.eup %308  ;;  %322 = vrsqrt.f32 %v221_v40  ;;  %v208_v42 = vld [vmem:[#allocation2 + $0x68] sm:$0xff] }
  0xae   :  { %v207_v43 = vld [vmem:[#allocation2 + $0x60] sm:$0xff]  ;;  %v311_v44 = vpop.eup %310  ;;  %248 = vst.msk [vmem:[%s506_s2 + $0x28] sm:$0xff] %vm14_vm0, %v309_v41  ;;  %v224_v45 = vadd.f32 1.0, %v208_v42 }
  0xaf   :  { %v223_v46 = vadd.f32 1.0, %v207_v43  ;;  %247 = vst.msk [vmem:[%s506_s2 + $0x20] sm:$0xff] %vm14_vm0, %v311_v44 }
  0xb0   :  { %324 = vrsqrt.f32 %v224_v45 }
  0xb1   :  { %v313_v47 = vpop.eup %312  ;;  %326 = vrsqrt.f32 %v223_v46  ;;  %v210_v48 = vld [vmem:[#allocation2 + $0x78] sm:$0xff] }
  0xb2   :  { %v209_v49 = vld [vmem:[#allocation2 + $0x70] sm:$0xff]  ;;  %v315_v50 = vpop.eup %314  ;;  %250 = vst.msk [vmem:[%s506_s2 + $0x38] sm:$0xff] %vm14_vm0, %v313_v47  ;;  %v226_v51 = vadd.f32 1.0, %v210_v48 }
  0xb3   :  { %v225_v52 = vadd.f32 1.0, %v209_v49  ;;  %249 = vst.msk [vmem:[%s506_s2 + $0x30] sm:$0xff] %vm14_vm0, %v315_v50 }
  0xb4   :  { %328 = vrsqrt.f32 %v226_v51 }
  0xb5   :  { %v317_v53 = vpop.eup %316  ;;  %330 = vrsqrt.f32 %v225_v52 }
  0xb6   :  { %v319_v54 = vpop.eup %318  ;;  %252 = vst.msk [vmem:[%s506_s2 + $0x48] sm:$0xff] %vm14_vm0, %v317_v53 }
  0xb7   :  { %251 = vst.msk [vmem:[%s506_s2 + $0x40] sm:$0xff] %vm14_vm0, %v319_v54 }
  0xb9   :  { %v321_v55 = vpop.eup %320 }
  0xba   :  { %v323_v56 = vpop.eup %322  ;;  %254 = vst.msk [vmem:[%s506_s2 + $0x58] sm:$0xff] %vm14_vm0, %v321_v55 }
  0xbb   :  { %253 = vst.msk [vmem:[%s506_s2 + $0x50] sm:$0xff] %vm14_vm0, %v323_v56 }
  0xbd   :  { %v325_v57 = vpop.eup %324 }
  0xbe   :  { %v327_v58 = vpop.eup %326  ;;  %256 = vst.msk [vmem:[%s506_s2 + $0x68] sm:$0xff] %vm14_vm0, %v325_v57 }
  0xbf   :  { %255 = vst.msk [vmem:[%s506_s2 + $0x60] sm:$0xff] %vm14_vm0, %v327_v58 }
  0xc1   :  { %v329_v59 = vpop.eup %328 }
  0xc2   :  { %v331_v60 = vpop.eup %330  ;;  %258 = vst.msk [vmem:[%s506_s2 + $0x78] sm:$0xff] %vm14_vm0, %v329_v59 }
  0xc3   :  { %257 = vst.msk [vmem:[%s506_s2 + $0x70] sm:$0xff] %vm14_vm0, %v331_v60 }

// kernel: gcn_layer.4
= control target key start
LH: loop header
LB: loop body
LE: loop exit
PB: predicated region body
PF: predicated region fallthrough
CT: control target
= control target key end

     0   :  { %v589_v2 = vmov 0   ;;  %s778_s1 = inlined_call_operand.vmem [shape: f32[128,128], index: 1, kind: input, shape index: {}]   ;;  %s779_s0 = inlined_call_operand.vmem [shape: f32[128,128], index: 0, kind: input, shape index: {}]   ;;  %s780_s2 = inlined_call_operand.vmem [shape: f32[128,1], index: 2, kind: input, shape index: {}]   ;;  %s781_s3 = inlined_call_operand.vmem [shape: bf16[128,128], index: 3, kind: output, shape index: {}]  }
   0x1   :  { %v45_v0 = vld [vmem:[%s778_s1 + $0x78] sm:$0xff]  ;;  %v44_v1 = vld [vmem:[%s778_s1 + $0x70] sm:$0xff]  ;;  %588 = vset.pattern.permute.xlu1 %v589_v2  ;;  %587 = vset.pattern.permute.xlu0 %v589_v2  ;;  %v43_v3 = vld [vmem:[%s778_s1 + $0x68] sm:$0xff] }
   0x2   :  { %498 = vmatprep.subr.mxu0 %v45_v0  ;;  %554 = vmatprep.subr.mxu1 %v45_v0  ;;  %v42_v4 = vld [vmem:[%s778_s1 + $0x60] sm:$0xff]  ;;  %v41_v5 = vld [vmem:[%s778_s1 + $0x58] sm:$0xff]  ;;  %v40_v6 = vld [vmem:[%s778_s1 + $0x50] sm:$0xff] }
   0x3   :  { %499 = vmatpush3.msra.mxu0 %v45_v0  ;;  %570 = vmatpush3.msra.mxu1 %v45_v0  ;;  %v39_v7 = vld [vmem:[%s778_s1 + $0x48] sm:$0xff]  ;;  %v38_v8 = vld [vmem:[%s778_s1 + $0x40] sm:$0xff]  ;;  %v37_v9 = vld [vmem:[%s778_s1 + $0x38] sm:$0xff] }
   0x4   :  { %500 = vmatprep.subr.mxu0 %v44_v1  ;;  %555 = vmatprep.subr.mxu1 %v44_v1  ;;  %v36_v10 = vld [vmem:[%s778_s1 + $0x30] sm:$0xff]  ;;  %v35_v11 = vld [vmem:[%s778_s1 + $0x28] sm:$0xff]  ;;  %v34_v12 = vld [vmem:[%s778_s1 + $0x20] sm:$0xff] }
   0x5   :  { %501 = vmatpush3.msra.mxu0 %v44_v1  ;;  %571 = vmatpush3.msra.mxu1 %v44_v1  ;;  %v33_v13 = vld [vmem:[%s778_s1 + $0x18] sm:$0xff]  ;;  %v32_v14 = vld [vmem:[%s778_s1 + $0x10] sm:$0xff]  ;;  %v31_v15 = vld [vmem:[%s778_s1 + $0x8] sm:$0xff] }
   0x6   :  { %502 = vmatprep.subr.mxu0 %v43_v3  ;;  %556 = vmatprep.subr.mxu1 %v43_v3  ;;  %v30_v16 = vld [vmem:[%s778_s1] sm:$0xff]  ;;  %v15_v19 = vld [vmem:[%s779_s0 + $0x8] sm:$0xff]  ;;  %v16_v21 = vld [vmem:[%s779_s0 + $0x10] sm:$0xff] }
   0x7   :  { %503 = vmatpush3.msra.mxu0 %v43_v3  ;;  %572 = vmatpush3.msra.mxu1 %v43_v3  ;;  %v14_v17 = vld [vmem:[%s779_s0] sm:$0xff]  ;;  %v23_v20 = vld [vmem:[%s779_s0 + $0x48] sm:$0xff]  ;;  %v24_v22 = vld [vmem:[%s779_s0 + $0x50] sm:$0xff] }
   0x8   :  { %504 = vmatprep.subr.mxu0 %v42_v4  ;;  %557 = vmatprep.subr.mxu1 %v42_v4  ;;  %v22_v18 = vld [vmem:[%s779_s0 + $0x40] sm:$0xff]  ;;  %v193_v23 = vld [vmem:[%s780_s2 + $0x10] sm:$0xff]  ;;  %v17_v25 = vld [vmem:[%s779_s0 + $0x18] sm:$0xff] }
   0x9   :  { %505 = vmatpush3.msra.mxu0 %v42_v4  ;;  %573 = vmatpush3.msra.mxu1 %v42_v4  ;;  %v191_v24 = vld [vmem:[%s780_s2] sm:$0xff]  ;;  %v25_v26 = vld [vmem:[%s779_s0 + $0x58] sm:$0xff]  ;;  %v192_v30 = vld [vmem:[%s780_s2 + $0x8] sm:$0xff] }
   0xa   :  { %506 = vmatprep.subr.mxu0 %v41_v5  ;;  %558 = vmatprep.subr.mxu1 %v41_v5  ;;  %v18_v27 = vld [vmem:[%s779_s0 + $0x20] sm:$0xff]  ;;  %v194_v29 = vld [vmem:[%s780_s2 + $0x18] sm:$0xff]  ;;  %v19_v31 = vld [vmem:[%s779_s0 + $0x28] sm:$0xff] }
   0xb   :  { %507 = vmatpush3.msra.mxu0 %v41_v5  ;;  %574 = vmatpush3.msra.mxu1 %v41_v5  ;;  %v26_v28 = vld [vmem:[%s779_s0 + $0x60] sm:$0xff]  ;;  %v27_v32 = vld [vmem:[%s779_s0 + $0x68] sm:$0xff]  ;;  %v20_v33 = vld [vmem:[%s779_s0 + $0x30] sm:$0xff] }
   0xc   :  { %508 = vmatprep.subr.mxu0 %v40_v6  ;;  %559 = vmatprep.subr.mxu1 %v40_v6  ;;  %v28_v34 = vld [vmem:[%s779_s0 + $0x70] sm:$0xff]  ;;  %v196_v35 = vld [vmem:[%s780_s2 + $0x28] sm:$0xff]  ;;  %v195_v36 = vld [vmem:[%s780_s2 + $0x20] sm:$0xff] }
   0xd   :  { %509 = vmatpush3.msra.mxu0 %v40_v6  ;;  %575 = vmatpush3.msra.mxu1 %v40_v6  ;;  %v21_v37 = vld [vmem:[%s779_s0 + $0x38] sm:$0xff]  ;;  %v197_v40 = vld [vmem:[%s780_s2 + $0x30] sm:$0xff]  ;;  %v200_v41 = vld [vmem:[%s780_s2 + $0x48] sm:$0xff] }
   0xe   :  { %510 = vmatprep.subr.mxu0 %v39_v7  ;;  %560 = vmatprep.subr.mxu1 %v39_v7  ;;  %v29_v38 = vld [vmem:[%s779_s0 + $0x78] sm:$0xff]  ;;  %v199_v42 = vld [vmem:[%s780_s2 + $0x40] sm:$0xff]  ;;  %v201_v44 = vld [vmem:[%s780_s2 + $0x50] sm:$0xff] }
   0xf   :  { %511 = vmatpush3.msra.mxu0 %v39_v7  ;;  %576 = vmatpush3.msra.mxu1 %v39_v7  ;;  %v198_v39 = vld [vmem:[%s780_s2 + $0x38] sm:$0xff]  ;;  %v204_v45 = vld [vmem:[%s780_s2 + $0x68] sm:$0xff]  ;;  %v203_v46 = vld [vmem:[%s780_s2 + $0x60] sm:$0xff] }
  0x10   :  { %512 = vmatprep.subr.mxu0 %v38_v8  ;;  %561 = vmatprep.subr.mxu1 %v38_v8  ;;  %v202_v43 = vld [vmem:[%s780_s2 + $0x58] sm:$0xff]  ;;  %v205_v48 = vld [vmem:[%s780_s2 + $0x70] sm:$0xff] }
  0x11   :  { %513 = vmatpush3.msra.mxu0 %v38_v8  ;;  %577 = vmatpush3.msra.mxu1 %v38_v8  ;;  %v206_v47 = vld [vmem:[%s780_s2 + $0x78] sm:$0xff] }
  0x12   :  { %514 = vmatprep.subr.mxu0 %v37_v9  ;;  %562 = vmatprep.subr.mxu1 %v37_v9 }
  0x13   :  { %515 = vmatpush3.msra.mxu0 %v37_v9  ;;  %578 = vmatpush3.msra.mxu1 %v37_v9 }
  0x14   :  { %516 = vmatprep.subr.mxu0 %v36_v10  ;;  %563 = vmatprep.subr.mxu1 %v36_v10 }
  0x15   :  { %517 = vmatpush3.msra.mxu0 %v36_v10  ;;  %579 = vmatpush3.msra.mxu1 %v36_v10 }
  0x16   :  { %518 = vmatprep.subr.mxu0 %v35_v11  ;;  %564 = vmatprep.subr.mxu1 %v35_v11 }
  0x17   :  { %519 = vmatpush3.msra.mxu0 %v35_v11  ;;  %580 = vmatpush3.msra.mxu1 %v35_v11 }
  0x18   :  { %520 = vmatprep.subr.mxu0 %v34_v12  ;;  %565 = vmatprep.subr.mxu1 %v34_v12 }
  0x19   :  { %521 = vmatpush3.msra.mxu0 %v34_v12  ;;  %581 = vmatpush3.msra.mxu1 %v34_v12 }
  0x1a   :  { %522 = vmatprep.subr.mxu0 %v33_v13  ;;  %566 = vmatprep.subr.mxu1 %v33_v13 }
  0x1b   :  { %523 = vmatpush3.msra.mxu0 %v33_v13  ;;  %582 = vmatpush3.msra.mxu1 %v33_v13 }
  0x1c   :  { %524 = vmatprep.subr.mxu0 %v32_v14  ;;  %567 = vmatprep.subr.mxu1 %v32_v14 }
  0x1d   :  { %525 = vmatpush3.msra.mxu0 %v32_v14  ;;  %583 = vmatpush3.msra.mxu1 %v32_v14 }
  0x1e   :  { %526 = vmatprep.subr.mxu0 %v31_v15  ;;  %568 = vmatprep.subr.mxu1 %v31_v15 }
  0x1f   :  { %527 = vmatpush3.msra.mxu0 %v31_v15  ;;  %584 = vmatpush3.msra.mxu1 %v31_v15 }
  0x20   :  { %528 = vmatprep.subr.mxu0 %v30_v16  ;;  %569 = vmatprep.subr.mxu1 %v30_v16 }
  0x21   :  { %529 = vmatpush3.msra.mxu0 %v30_v16  ;;  %585 = vmatpush3.msra.mxu1 %v30_v16 }
  0x22   :  { %530 = vmatprep.mubr.f32.mxu0 %v14_v17  ;;  %542 = vmatprep.mubr.f32.mxu1 %v22_v18 }
  0x23   :  { %531 = vmatmul.mubr.f32.vlgmr.msra.gmra.mxu0 %v15_v19  ;;  %543 = vmatmul.mubr.f32.vlgmr.msra.gmra.mxu1 %v23_v20 }
  0x24   :  { %533 = vmatprep.mubr.f32.mxu0 %v16_v21  ;;  %545 = vmatprep.mubr.f32.mxu1 %v24_v22 }
  0x25   :  { %219 = vperm.xlu1 %588, %v193_v23   ;;  %209 = vperm.xlu0 %587, %v191_v24  }
  0x27   :  { %534 = vmatmul.mubr.f32.gmra.mxu0 %v17_v25  ;;  %546 = vmatmul.mubr.f32.gmra.mxu1 %v25_v26 }
  0x28   :  { %536 = vmatprep.mubr.f32.mxu0 %v18_v27  ;;  %548 = vmatprep.mubr.f32.mxu1 %v26_v28 }
  0x29   :  { %224 = vperm.xlu1 %588, %v194_v29   ;;  %214 = vperm.xlu0 %587, %v192_v30  }
  0x2b   :  { %537 = vmatmul.mubr.f32.gmra.mxu0 %v19_v31  ;;  %549 = vmatmul.mubr.f32.gmra.mxu1 %v27_v32 }
  0x2c   :  { %539 = vmatprep.mubr.f32.mxu0 %v20_v33  ;;  %551 = vmatprep.mubr.f32.mxu1 %v28_v34 }
  0x2d   :  { %234 = vperm.xlu1 %588, %v196_v35   ;;  %229 = vperm.xlu0 %587, %v195_v36  }
  0x2f   :  { %540 = vmatmul.mubr.f32.gmra.mxu0 %v21_v37  ;;  %552 = vmatmul.mubr.f32.gmra.mxu1 %v29_v38 }
  0x31   :  { %244 = vperm.xlu1 %588, %v198_v39   ;;  %239 = vperm.xlu0 %587, %v197_v40  }
  0x35   :  { %254 = vperm.xlu1 %588, %v200_v41   ;;  %249 = vperm.xlu0 %587, %v199_v42  }
  0x39   :  { %264 = vperm.xlu1 %588, %v202_v43   ;;  %259 = vperm.xlu0 %587, %v201_v44  }
  0x3d   :  { %274 = vperm.xlu1 %588, %v204_v45   ;;  %269 = vperm.xlu0 %587, %v203_v46  }
  0x41   :  { %284 = vperm.xlu1 %588, %v206_v47   ;;  %279 = vperm.xlu0 %587, %v205_v48  }
  0xa0   :  { %v220_v49 = vpop.permute.xlu1 %219  ;;  %v210_v50 = vpop.permute.xlu0 %209 }
  0xa4   :  { %v225_v51 = vpop.permute.xlu1 %224  ;;  %v215_v52 = vpop.permute.xlu0 %214 }
  0xa8   :  { %v235_v53 = vpop.permute.xlu1 %234  ;;  %v230_v54 = vpop.permute.xlu0 %229 }
  0xac   :  { %v245_v55 = vpop.permute.xlu1 %244  ;;  %v240_v56 = vpop.permute.xlu0 %239 }
  0xb0   :  { %v255_v57 = vpop.permute.xlu1 %254  ;;  %v250_v58 = vpop.permute.xlu0 %249 }
  0xb4   :  { %v265_v61 = vpop.permute.xlu1 %264  ;;  %v260_v62 = vpop.permute.xlu0 %259 }
  0xb8   :  { %v275_v11 = vpop.permute.xlu1 %274  ;;  %v270_v12 = vpop.permute.xlu0 %269 }
  0xbc   :  { %v285_v29 = vpop.permute.xlu1 %284  ;;  %v280_v30 = vpop.permute.xlu0 %279 }
  0xe3   :  { %v532_v59 = vpop.f32.mrf.mxu0  ;;  %v544_v60 = vpop.f32.mrf.mxu1 }
  0xe4   :  { %v288_v1 = vmul.f32 %v532_v59, %v215_v52  ;;  %v296_v2 = vmul.f32 %v544_v60, %v255_v57 }
  0xe5   :  { %v112_v63 = vpop.f32.mrf.mxu0  ;;  %v152_v0 = vpop.f32.mrf.mxu1 }
  0xe6   :  { %v287_v3 = vmul.f32 %v210_v50, %v112_v63  ;;  %v295_v4 = vmul.f32 %v250_v58, %v152_v0 }
  0xe7   :  { %v535_v5 = vpop.f32.mrf.mxu0  ;;  %v547_v6 = vpop.f32.mrf.mxu1 }
  0xe8   :  { %v422_v7 = vpack.c.bf16 %v288_v1, %v287_v3  ;;  %v442_v8 = vpack.c.bf16 %v296_v2, %v295_v4  ;;  %v290_v13 = vmul.f32 %v535_v5, %v225_v51  ;;  %v298_v14 = vmul.f32 %v547_v6, %v265_v61 }
  0xe9   :  { %v122_v9 = vpop.f32.mrf.mxu0  ;;  %v162_v10 = vpop.f32.mrf.mxu1 }
  0xea   :  { %423 = vst [vmem:[%s781_s3] sm:$0xff] %v422_v7   ;;  %462 = vst [vmem:[%s781_s3 + $0x20] sm:$0xff] %v442_v8   ;;  %v289_v15 = vmul.f32 %v220_v49, %v122_v9  ;;  %v297_v16 = vmul.f32 %v260_v62, %v162_v10 }
  0xeb   :  { %v538_v17 = vpop.f32.mrf.mxu0  ;;  %v550_v18 = vpop.f32.mrf.mxu1 }
  0xec   :  { %v427_v19 = vpack.c.bf16 %v290_v13, %v289_v15  ;;  %v447_v20 = vpack.c.bf16 %v298_v14, %v297_v16  ;;  %v292_v23 = vmul.f32 %v538_v17, %v235_v53  ;;  %v300_v24 = vmul.f32 %v550_v18, %v275_v11 }
  0xed   :  { %v132_v21 = vpop.f32.mrf.mxu0  ;;  %v172_v22 = vpop.f32.mrf.mxu1 }
  0xee   :  { %459 = vst [vmem:[%s781_s3 + $0x8] sm:$0xff] %v427_v19   ;;  %463 = vst [vmem:[%s781_s3 + $0x28] sm:$0xff] %v447_v20   ;;  %v291_v25 = vmul.f32 %v230_v54, %v132_v21  ;;  %v299_v26 = vmul.f32 %v270_v12, %v172_v22 }
  0xef   :  { %v541_v27 = vpop.f32.mrf.mxu0  ;;  %v553_v28 = vpop.f32.mrf.mxu1 }
  0xf0   :  { %v432_v31 = vpack.c.bf16 %v292_v23, %v291_v25  ;;  %v452_v32 = vpack.c.bf16 %v300_v24, %v299_v26  ;;  %v294_v35 = vmul.f32 %v541_v27, %v245_v55  ;;  %v302_v36 = vmul.f32 %v553_v28, %v285_v29 }
  0xf1   :  { %v142_v33 = vpop.f32.mrf.mxu0  ;;  %v182_v34 = vpop.f32.mrf.mxu1 }
  0xf2   :  { %460 = vst [vmem:[%s781_s3 + $0x10] sm:$0xff] %v432_v31   ;;  %464 = vst [vmem:[%s781_s3 + $0x30] sm:$0xff] %v452_v32   ;;  %v293_v37 = vmul.f32 %v240_v56, %v142_v33  ;;  %v301_v38 = vmul.f32 %v280_v30, %v182_v34 }
  0xf4   :  { %v437_v39 = vpack.c.bf16 %v294_v35, %v293_v37  ;;  %v457_v40 = vpack.c.bf16 %v302_v36, %v301_v38 }
  0xf6   :  { %461 = vst [vmem:[%s781_s3 + $0x18] sm:$0xff] %v437_v39   ;;  %465 = vst [vmem:[%s781_s3 + $0x38] sm:$0xff] %v457_v40  }

// kernel: gcn_layer.5
= control target key start
LH: loop header
LB: loop body
LE: loop exit
PB: predicated region body
PF: predicated region fallthrough
CT: control target
= control target key end

     0   :  { %v591_v1 = vmov 0   ;;  %s810_s2 = inlined_call_operand.vmem [shape: bf16[128,128], index: 2, kind: input, shape index: {}]   ;;  %s811_s1 = inlined_call_operand.vmem [shape: s8[128,128], index: 1, kind: input, shape index: {}]   ;;  %s812_s0 = inlined_call_operand.vmem [shape: f32[128,1], index: 0, kind: input, shape index: {}]   ;;  %s813_s3 = inlined_call_operand.vmem [shape: f32[128,128], index: 3, kind: output, shape index: {}]  }
   0x1   :  { %v583_v0 = vld [vmem:[%s810_s2 + $0x38] sm:$0xff]   ;;  %582 = vset.pattern.permute.xlu1 %v591_v1  ;;  %581 = vset.pattern.permute.xlu0 %v591_v1  ;;  %v584_v2 = vld [vmem:[%s810_s2 + $0x30] sm:$0xff]   ;;  %v585_v3 = vld [vmem:[%s810_s2 + $0x28] sm:$0xff]  }
   0x2   :  { %532 = vmatprep.subr.bf16.mxu0 %v583_v0  ;;  %564 = vmatprep.subr.bf16.mxu1 %v583_v0  ;;  %v586_v4 = vld [vmem:[%s810_s2 + $0x20] sm:$0xff]   ;;  %v632_v6 = vld [vmem:[%s811_s1 + $0x10] sm:$0xff]  ;;  %v320_v11 = vld [vmem:[%s812_s0 + $0x18] sm:$0xff] }
   0x3   :  { %533 = vmatpush3.bf16.msra.mxu0 %v583_v0  ;;  %572 = vmatpush3.bf16.msra.mxu1 %v583_v0  ;;  %v627_v5 = vld [vmem:[%s811_s1] sm:$0xff]  ;;  %v97_v8 = vunpack.c.l.s8.bf16 %v632_v6  ;;  %v319_v9 = vld [vmem:[%s812_s0 + $0x10] sm:$0xff]  ;;  %v318_v12 = vld [vmem:[%s812_s0 + $0x8] sm:$0xff]  ;;  %v98_v28 = vunpack.c.h.s8.bf16 %v632_v6 }
   0x4   :  { %534 = vmatprep.subr.bf16.mxu0 %v584_v2  ;;  %565 = vmatprep.subr.bf16.mxu1 %v584_v2  ;;  %v93_v7 = vunpack.c.l.s8.bf16 %v627_v5  ;;  %v317_v10 = vld [vmem:[%s812_s0] sm:$0xff]  ;;  %v587_v13 = vld [vmem:[%s810_s2 + $0x18] sm:$0xff]   ;;  %v322_v14 = vld [vmem:[%s812_s0 + $0x28] sm:$0xff]  ;;  %v94_v27 = vunpack.c.h.s8.bf16 %v627_v5 }
   0x5   :  { %345 = vperm.xlu1 %582, %v319_v9   ;;  %335 = vperm.xlu0 %581, %v317_v10   ;;  %v321_v15 = vld [vmem:[%s812_s0 + $0x20] sm:$0xff]  ;;  %v588_v16 = vld [vmem:[%s810_s2 + $0x10] sm:$0xff]   ;;  %v324_v17 = vld [vmem:[%s812_s0 + $0x38] sm:$0xff] }
   0x6   :  { %548 = vmatprep.mubr.bf16.mxu0 %v93_v7  ;;  %556 = vmatprep.mubr.bf16.mxu1 %v97_v8  ;;  %v323_v18 = vld [vmem:[%s812_s0 + $0x30] sm:$0xff]  ;;  %v589_v19 = vld [vmem:[%s810_s2 + $0x8] sm:$0xff]   ;;  %v325_v21 = vld [vmem:[%s812_s0 + $0x40] sm:$0xff] }
   0x7   :  { %535 = vmatpush3.bf16.msra.mxu0 %v584_v2  ;;  %573 = vmatpush3.bf16.msra.mxu1 %v584_v2  ;;  %v326_v20 = vld [vmem:[%s812_s0 + $0x48] sm:$0xff]  ;;  %v590_v22 = vld [vmem:[%s810_s2] sm:$0xff]   ;;  %v328_v23 = vld [vmem:[%s812_s0 + $0x58] sm:$0xff] }
   0x8   :  { %536 = vmatprep.subr.bf16.mxu0 %v585_v3  ;;  %566 = vmatprep.subr.bf16.mxu1 %v585_v3  ;;  %v327_v24 = vld [vmem:[%s812_s0 + $0x50] sm:$0xff]  ;;  %v90_v25 = vld [vmem:[%s811_s1 + $0x8] sm:$0xff]  ;;  %v92_v26 = vld [vmem:[%s811_s1 + $0x18] sm:$0xff] }
   0x9   :  { %350 = vperm.xlu1 %582, %v320_v11   ;;  %340 = vperm.xlu0 %581, %v318_v12   ;;  %v95_v29 = vunpack.c.l.s8.bf16 %v90_v25  ;;  %v99_v30 = vunpack.c.l.s8.bf16 %v92_v26  ;;  %v330_v31 = vld [vmem:[%s812_s0 + $0x68] sm:$0xff]  ;;  %v329_v32 = vld [vmem:[%s812_s0 + $0x60] sm:$0xff]  ;;  %v332_v33 = vld [vmem:[%s812_s0 + $0x78] sm:$0xff]  ;;  %v96_v35 = vunpack.c.h.s8.bf16 %v90_v25  ;;  %v100_v36 = vunpack.c.h.s8.bf16 %v92_v26 }
   0xa   :  { %v331_v34 = vld [vmem:[%s812_s0 + $0x70] sm:$0xff]  ;;  %v509_v46 = vld [vmem:[%s810_s2 + $0x8] sm:$0xff]   ;;  %v478_v49 = vld [vmem:[%s810_s2] sm:$0xff]  }
   0xb   :  { %537 = vmatpush3.bf16.msra.mxu0 %v585_v3  ;;  %574 = vmatpush3.bf16.msra.mxu1 %v585_v3  ;;  %v513_v47 = vld [vmem:[%s810_s2 + $0x28] sm:$0xff]   ;;  %v512_v50 = vld [vmem:[%s810_s2 + $0x20] sm:$0xff]   ;;  %v483_v52 = vunpack.c.l.bf16 %v509_v46  ;;  %v479_v54 = vunpack.c.l.bf16 %v478_v49  ;;  %v729_v61 = vld [vmem:[%s810_s2 + $0x18] sm:$0xff]   ;;  %v484_v1 = vunpack.c.h.bf16 %v509_v46  ;;  %v480_v3 = vunpack.c.h.bf16 %v478_v49 }
   0xc   :  { %538 = vmatprep.subr.bf16.mxu0 %v586_v4  ;;  %567 = vmatprep.subr.bf16.mxu1 %v586_v4  ;;  %v499_v53 = vunpack.c.l.bf16 %v513_v47  ;;  %v495_v55 = vunpack.c.l.bf16 %v512_v50  ;;  %v734_v62 = vld [vmem:[%s810_s2 + $0x38] sm:$0xff]   ;;  %v500_v2 = vunpack.c.h.bf16 %v513_v47  ;;  %v741_v10 = vld [vmem:[%s810_s2 + $0x10] sm:$0xff]  }
   0xd   :  { %360 = vperm.xlu1 %582, %v322_v14   ;;  %355 = vperm.xlu0 %581, %v321_v15   ;;  %v746_v11 = vld [vmem:[%s810_s2 + $0x30] sm:$0xff]   ;;  %v491_v14 = vunpack.c.l.bf16 %v729_v61  ;;  %v507_v15 = vunpack.c.l.bf16 %v734_v62 }
   0xe   :  { %v503_v25 = vunpack.c.l.bf16 %v746_v11 }
   0xf   :  { %539 = vmatpush3.bf16.msra.mxu0 %v586_v4  ;;  %575 = vmatpush3.bf16.msra.mxu1 %v586_v4  ;;  %v496_v4 = vunpack.c.h.bf16 %v512_v50 }
  0x10   :  { %540 = vmatprep.subr.bf16.mxu0 %v587_v13  ;;  %568 = vmatprep.subr.bf16.mxu1 %v587_v13 }
  0x11   :  { %370 = vperm.xlu1 %582, %v324_v17   ;;  %365 = vperm.xlu0 %581, %v323_v18  }
  0x13   :  { %541 = vmatpush3.bf16.msra.mxu0 %v587_v13  ;;  %576 = vmatpush3.bf16.msra.mxu1 %v587_v13 }
  0x14   :  { %542 = vmatprep.subr.bf16.mxu0 %v588_v16  ;;  %569 = vmatprep.subr.bf16.mxu1 %v588_v16 }
  0x15   :  { %380 = vperm.xlu1 %582, %v326_v20   ;;  %375 = vperm.xlu0 %581, %v325_v21  }
  0x17   :  { %543 = vmatpush3.bf16.msra.mxu0 %v588_v16  ;;  %577 = vmatpush3.bf16.msra.mxu1 %v588_v16 }
  0x18   :  { %544 = vmatprep.subr.bf16.mxu0 %v589_v19  ;;  %570 = vmatprep.subr.bf16.mxu1 %v589_v19 }
  0x19   :  { %390 = vperm.xlu1 %582, %v328_v23   ;;  %385 = vperm.xlu0 %581, %v327_v24   ;;  %v487_v24 = vunpack.c.l.bf16 %v741_v10 }
  0x1b   :  { %545 = vmatpush3.bf16.msra.mxu0 %v589_v19  ;;  %578 = vmatpush3.bf16.msra.mxu1 %v589_v19 }
  0x1c   :  { %546 = vmatprep.subr.bf16.mxu0 %v590_v22  ;;  %571 = vmatprep.subr.bf16.mxu1 %v590_v22 }
  0x1d   :  { %400 = vperm.xlu1 %582, %v330_v31   ;;  %395 = vperm.xlu0 %581, %v329_v32  }
  0x1f   :  { %547 = vmatpush3.bf16.msra.mxu0 %v590_v22  ;;  %579 = vmatpush3.bf16.msra.mxu1 %v590_v22 }
  0x21   :  { %410 = vperm.xlu1 %582, %v332_v33   ;;  %405 = vperm.xlu0 %581, %v331_v34  }
  0x22   :  { %549 = vmatmul.mubr.bf16.vlgmr.msra.gmra.mxu0 %v94_v27  ;;  %557 = vmatmul.mubr.bf16.vlgmr.msra.gmra.mxu1 %v98_v28 }
  0x23   :  { %552 = vmatprep.mubr.bf16.mxu0 %v95_v29  ;;  %560 = vmatprep.mubr.bf16.mxu1 %v99_v30 }
  0x2a   :  { %553 = vmatmul.mubr.bf16.gmra.mxu0 %v96_v35  ;;  %561 = vmatmul.mubr.bf16.gmra.mxu1 %v100_v36  ;;  %v492_v35 = vunpack.c.h.bf16 %v729_v61  ;;  %v508_v36 = vunpack.c.h.bf16 %v734_v62 }
  0x80   :  { %v336_v37 = vpop.permute.xlu0 %335  ;;  %v346_v38 = vpop.permute.xlu1 %345 }
  0x84   :  { %v704_v39 = vpop.permute.xlu0 %340  ;;  %v351_v40 = vpop.permute.xlu1 %350 }
  0x88   :  { %v706_v41 = vpop.permute.xlu0 %355  ;;  %v708_v42 = vpop.permute.xlu1 %360 }
  0x8c   :  { %v710_v43 = vpop.permute.xlu0 %365  ;;  %v712_v44 = vpop.permute.xlu1 %370 }
  0x90   :  { %v376_v45 = vpop.permute.xlu0 %375  ;;  %v381_v48 = vpop.permute.xlu1 %380 }
  0x94   :  { %v386_v51 = vpop.permute.xlu0 %385  ;;  %v391_v58 = vpop.permute.xlu1 %390 }
  0x98   :  { %v736_v5 = vpop.permute.xlu0 %395  ;;  %v401_v26 = vpop.permute.xlu1 %400 }
  0xe2   :  { %v550_v56 = vpop.f32.mrf.mxu0  ;;  %v558_v57 = vpop.f32.mrf.mxu1 }
  0xe3   :  { %v268_v59 = vadd.f32 %v550_v56, %v483_v52  ;;  %v276_v60 = vadd.f32 %v558_v57, %v499_v53  ;;  %v488_v52 = vunpack.c.h.bf16 %v741_v10  ;;  %v504_v53 = vunpack.c.h.bf16 %v746_v11 }
  0xe4   :  { %v203_v63 = vpop.f32.mrf.mxu0  ;;  %v235_v0 = vpop.f32.mrf.mxu1 }
  0xe5   :  { %v415_v6 = vmul.f32 %v346_v38, %v268_v59  ;;  %v423_v7 = vmul.f32 %v386_v51, %v276_v60  ;;  %v266_v8 = vadd.f32 %v479_v54, %v203_v63  ;;  %v274_v9 = vadd.f32 %v495_v55, %v235_v0  ;;  %v411_v60 = vpop.permute.xlu1 %410 }
  0xe6   :  { %v551_v12 = vpop.f32.mrf.mxu0  ;;  %v559_v13 = vpop.f32.mrf.mxu1 }
  0xe7   :  { %v431_v16 = vmax.f32 %v415_v6, 0.0  ;;  %v439_v17 = vmax.f32 %v423_v7, 0.0  ;;  %v413_v18 = vmul.f32 %v336_v37, %v266_v8  ;;  %v421_v19 = vmul.f32 %v376_v45, %v274_v9  ;;  %v406_v37 = vpop.permute.xlu0 %405 }
  0xe8   :  { %v269_v20 = vadd.f32 %v551_v12, %v484_v1  ;;  %v277_v21 = vadd.f32 %v559_v13, %v500_v2  ;;  %v206_v22 = vpop.f32.mrf.mxu0  ;;  %v238_v23 = vpop.f32.mrf.mxu1 }
  0xe9   :  { %447 = vst [vmem:[%s813_s3 + $0x10] sm:$0xff] %v431_v16  ;;  %455 = vst [vmem:[%s813_s3 + $0x50] sm:$0xff] %v439_v17  ;;  %v429_v27 = vmax.f32 %v413_v18, 0.0  ;;  %v437_v28 = vmax.f32 %v421_v19, 0.0  ;;  %v267_v29 = vadd.f32 %v480_v3, %v206_v22  ;;  %v275_v30 = vadd.f32 %v496_v4, %v238_v23 }
  0xea   :  { %v416_v31 = vmul.f32 %v351_v40, %v269_v20  ;;  %v424_v32 = vmul.f32 %v391_v58, %v277_v21  ;;  %v554_v33 = vpop.f32.mrf.mxu0  ;;  %v562_v34 = vpop.f32.mrf.mxu1 }
  0xeb   :  { %445 = vst [vmem:[%s813_s3] sm:$0xff] %v429_v27  ;;  %453 = vst [vmem:[%s813_s3 + $0x40] sm:$0xff] %v437_v28  ;;  %v414_v38 = vmul.f32 %v704_v39, %v267_v29  ;;  %v422_v45 = vmul.f32 %v381_v48, %v275_v30  ;;  %v272_v40 = vadd.f32 %v554_v33, %v491_v14 }
  0xec   :  { %v280_v46 = vadd.f32 %v562_v34, %v507_v15  ;;  %v432_v47 = vmax.f32 %v416_v31, 0.0  ;;  %v440_v49 = vmax.f32 %v424_v32, 0.0  ;;  %v219_v50 = vpop.f32.mrf.mxu0  ;;  %v251_v51 = vpop.f32.mrf.mxu1 }
  0xed   :  { %v430_v54 = vmax.f32 %v414_v38, 0.0  ;;  %v438_v55 = vmax.f32 %v422_v45, 0.0  ;;  %v419_v56 = vmul.f32 %v710_v43, %v272_v40  ;;  %v270_v39 = vadd.f32 %v487_v24, %v219_v50 }
  0xee   :  { %v427_v57 = vmul.f32 %v406_v37, %v280_v46  ;;  %448 = vst [vmem:[%s813_s3 + $0x18] sm:$0xff] %v432_v47  ;;  %456 = vst [vmem:[%s813_s3 + $0x58] sm:$0xff] %v440_v49  ;;  %v278_v48 = vadd.f32 %v503_v25, %v251_v51  ;;  %v555_v58 = vpop.f32.mrf.mxu0  ;;  %v563_v59 = vpop.f32.mrf.mxu1 }
  0xef   :  { %446 = vst [vmem:[%s813_s3 + $0x8] sm:$0xff] %v430_v54  ;;  %454 = vst [vmem:[%s813_s3 + $0x48] sm:$0xff] %v438_v55  ;;  %v435_v43 = vmax.f32 %v419_v56, 0.0  ;;  %v273_v62 = vadd.f32 %v555_v58, %v492_v35  ;;  %v281_v63 = vadd.f32 %v563_v59, %v508_v36  ;;  %v417_v0 = vmul.f32 %v706_v41, %v270_v39 }
  0xf0   :  { %v443_v61 = vmax.f32 %v427_v57, 0.0  ;;  %v425_v1 = vmul.f32 %v736_v5, %v278_v48  ;;  %v222_v2 = vpop.f32.mrf.mxu0  ;;  %v254_v3 = vpop.f32.mrf.mxu1 }
  0xf1   :  { %451 = vst [vmem:[%s813_s3 + $0x30] sm:$0xff] %v435_v43  ;;  %v420_v4 = vmul.f32 %v712_v44, %v273_v62  ;;  %v428_v6 = vmul.f32 %v411_v60, %v281_v63  ;;  %v271_v7 = vadd.f32 %v488_v52, %v222_v2  ;;  %v279_v8 = vadd.f32 %v504_v53, %v254_v3 }
  0xf2   :  { %459 = vst [vmem:[%s813_s3 + $0x70] sm:$0xff] %v443_v61  ;;  %v433_v9 = vmax.f32 %v417_v0, 0.0  ;;  %v441_v10 = vmax.f32 %v425_v1, 0.0 }
  0xf3   :  { %v436_v41 = vmax.f32 %v420_v4, 0.0  ;;  %v444_v11 = vmax.f32 %v428_v6, 0.0  ;;  %v418_v5 = vmul.f32 %v708_v42, %v271_v7  ;;  %v426_v12 = vmul.f32 %v401_v26, %v279_v8 }
  0xf4   :  { %449 = vst [vmem:[%s813_s3 + $0x20] sm:$0xff] %v433_v9  ;;  %457 = vst [vmem:[%s813_s3 + $0x60] sm:$0xff] %v441_v10 }
  0xf5   :  { %452 = vst [vmem:[%s813_s3 + $0x38] sm:$0xff] %v436_v41  ;;  %460 = vst [vmem:[%s813_s3 + $0x78] sm:$0xff] %v444_v11  ;;  %v434_v44 = vmax.f32 %v418_v5, 0.0  ;;  %v442_v13 = vmax.f32 %v426_v12, 0.0 }
  0xf7   :  { %450 = vst [vmem:[%s813_s3 + $0x28] sm:$0xff] %v434_v44  ;;  %458 = vst [vmem:[%s813_s3 + $0x68] sm:$0xff] %v442_v13 }

</bundles_post_ra>
